<compile_context>
chip_gen: v6e
topology: v6e:2x2x1
jax: 0.10.0
libtpu: 0.0.40
codegen_flags: <defaults>
</compile_context>

<pallas_src>
import functools

import jax
import jax.numpy as jnp
from jax.experimental import pallas as pl
from jax.experimental.pallas import tpu as pltpu

MODELS_TENSOR_PREDICITONS_KEY = "model_predictions"
OTHER_KEY = "other"

_LANE = 128
_MIN_TILE_M = 16  # bf16 packs two rows per sublane -> keep row tiles >= 16


def _round_up(x, m):
    return ((x + m - 1) // m) * m


def _vmem_capacity_bytes():
    """Per-core VMEM capacity (generation-aware), with a conservative fallback."""
    try:
        cap = getattr(pltpu.get_tpu_info(), "vmem_capacity_bytes", None)
        if cap:
            return int(cap)
    except Exception:
        pass
    return 64 * 1024 * 1024  # v7x per-core VMEM; safe lower bound everywhere


def _choose_tile_m(n, requested):
    """Pick the row tile: large (512/1024) for MXU fill, multiple of 16, and
    capped at ceil(n/2) so the parallel grid has >= 2 steps (v7x: 2 TCs)."""
    if n <= _MIN_TILE_M:
        return max(n, 1)  # single block spanning all rows (== full array dim)
    if requested is not None:
        tile = max(_MIN_TILE_M, (int(requested) // _MIN_TILE_M) * _MIN_TILE_M)
    else:
        tile = 1024 if n >= 4096 else 512
    # Keep at least two grid steps so both v7x TensorCores get work.
    tile = min(tile, _round_up(pl.cdiv(n, 2), _MIN_TILE_M))
    # Keep the tile <= n (ragged tail handled by Pallas boundary blocks).
    tile = min(tile, (n // _MIN_TILE_M) * _MIN_TILE_M)
    return max(tile, _MIN_TILE_M)


# ----------------------------------------------------------------------------
# Pallas kernel: fused 4-layer MLP  (Linear -> ReLU) x3 -> Linear
# ----------------------------------------------------------------------------
def _mlp_kernel(x_ref, w0_ref, w1_ref, w2_ref, w3_ref, o_ref):
    # f32 x tile cast to bf16 in-kernel (VPU), bf16 operands into the MXU with
    # f32 accumulation; ReLU on the f32 accumulator, cast down to bf16 only
    # right before the next matmul.
    x = x_ref[...].astype(jnp.bfloat16)
    h = jnp.dot(x, w0_ref[...], preferred_element_type=jnp.float32)
    h = jnp.maximum(h, 0.0).astype(jnp.bfloat16)
    h = jnp.dot(h, w1_ref[...], preferred_element_type=jnp.float32)
    h = jnp.maximum(h, 0.0).astype(jnp.bfloat16)
    h = jnp.dot(h, w2_ref[...], preferred_element_type=jnp.float32)
    h = jnp.maximum(h, 0.0).astype(jnp.bfloat16)
    out = jnp.dot(h, w3_ref[...], preferred_element_type=jnp.float32)
    o_ref[...] = out.astype(o_ref.dtype)  # bf16 lane-dense store


@functools.partial(jax.jit, static_argnames=("d_out", "tile_m"))
def fused_mlp(x2d, w0, w1, w2, w3, *, d_out, tile_m=None):
    """x2d: (N, D_in) f32 (unpadded).  w*: bf16 weights stored (in, out); the
    H / D_out axes are pre-padded to multiples of 128.  Returns (N, d_out) f32."""
    n, d_in = x2d.shape
    h_p = w0.shape[1]
    d_out_p = w3.shape[1]

    tm = _choose_tile_m(n, tile_m)
    grid_m = pl.cdiv(n, tm)

    vmem_cap = _vmem_capacity_bytes()
    weights_bytes = 2 * (w0.size + w1.size + w2.size + w3.size)
    if weights_bytes > 0.7 * vmem_cap:
        # TODO(synk): stream w1/w2 over their output dimension with pipelined
        # BlockSpecs / pltpu.emit_pipeline instead of whole-array VMEM residents
        # when H is too large for per-core VMEM (e.g. H >= 4096 on v7x).
        raise NotImplementedError(
            f"Resident bf16 weights ({weights_bytes} B) exceed ~70% of per-core "
            f"VMEM ({vmem_cap} B); streamed-weight path not implemented.")

    # VMEM budget: resident weights (single-buffered) + double-buffered x/out
    # tiles + live f32/bf16 intermediates, with ~2x headroom; capped
    # generation-aware at ~85% of the per-core VMEM capacity.
    x_tile_bytes = 4 * tm * d_in
    out_tile_bytes = 2 * tm * d_out_p
    inter_bytes = 6 * tm * h_p
    vmem_est = weights_bytes + 2 * x_tile_bytes + 2 * out_tile_bytes + 2 * inter_bytes
    vmem_limit = int(min(max(2 * vmem_est, 32 * 1024 * 1024),
                         int(0.85 * vmem_cap)))

    flops = 2 * n * (d_in * h_p + 2 * h_p * h_p + h_p * d_out_p)
    bytes_accessed = weights_bytes + n * (4 * d_in + 2 * d_out_p)

    out_p = pl.pallas_call(
        _mlp_kernel,
        out_shape=jax.ShapeDtypeStruct((n, d_out_p), jnp.bfloat16),
        grid_spec=pltpu.PrefetchScalarGridSpec(
            num_scalar_prefetch=0,
            grid=(grid_m,),
            in_specs=[
                # x: (tile_m, D_in) f32 blocks; D_in spans the full array dim
                # so no lane padding of the activations is required.
                pl.BlockSpec((tm, d_in), lambda i: (i, 0)),
                # Weights: whole-array, single-buffered VMEM residents.
                pl.BlockSpec(memory_space=pltpu.MemorySpace.VMEM),
                pl.BlockSpec(memory_space=pltpu.MemorySpace.VMEM),
                pl.BlockSpec(memory_space=pltpu.MemorySpace.VMEM),
                pl.BlockSpec(memory_space=pltpu.MemorySpace.VMEM),
            ],
            out_specs=pl.BlockSpec((tm, d_out_p), lambda i: (i, 0)),
        ),
        compiler_params=pltpu.CompilerParams(
            dimension_semantics=("parallel",),
            vmem_limit_bytes=vmem_limit,
        ),
        cost_estimate=pl.CostEstimate(
            flops=flops, transcendentals=0, bytes_accessed=bytes_accessed),
    )(x2d, w0, w1, w2, w3)

    # Drop the lane padding of the last layer; return f32 (module's dtype).
    return out_p[:, :d_out].astype(jnp.float32)


# ----------------------------------------------------------------------------
# Parameter construction (deterministic xavier-uniform, mirrors init_weights)
# ----------------------------------------------------------------------------
def xavier_uniform(key, fan_in, fan_out, dtype=jnp.float32):
    bound = (6.0 / (fan_in + fan_out)) ** 0.5
    # stored (in, out) so the kernel computes x @ W (== x @ W_torch.T)
    return jax.random.uniform(key, (fan_in, fan_out), dtype, -bound, bound)


def _pad_weight_bf16(w, rows_p, cols_p):
    r, c = w.shape
    return jnp.zeros((rows_p, cols_p), jnp.bfloat16).at[:r, :c].set(
        w.astype(jnp.bfloat16))


class EncoderDecoderPredictorPallas:
    """JAX/Pallas re-implementation of EncoderDecoderPredictor's forward pass."""

    def __init__(self, input_dim, output_dim, prediction_horizon,
                 l0_units=1024, key=jax.random.PRNGKey(0), tile_m=None):
        assert output_dim % prediction_horizon == 0
        self.prediction_horizon = prediction_horizon
        self.output_dim = output_dim
        self.tile_m = tile_m

        h = l0_units
        h_p = _round_up(h, _LANE)
        d_out_p = _round_up(output_dim, _LANE)

        k0, k1, k2, k3 = jax.random.split(key, 4)
        # f32 masters (match PyTorch xavier init numerics) ...
        self.w0_f32 = xavier_uniform(k0, input_dim, h)
        self.w1_f32 = xavier_uniform(k1, h, h)
        self.w2_f32 = xavier_uniform(k2, h, h)
        self.w3_f32 = xavier_uniform(k3, h, output_dim)
        # ... padded (H / D_out axes only) + stored in bf16 for MXU throughput
        # and half the weight VMEM/HBM footprint (padding cols/rows are zeros).
        self.w0 = _pad_weight_bf16(self.w0_f32, input_dim, h_p)
        self.w1 = _pad_weight_bf16(self.w1_f32, h_p, h_p)
        self.w2 = _pad_weight_bf16(self.w2_f32, h_p, h_p)
        self.w3 = _pad_weight_bf16(self.w3_f32, h_p, d_out_p)
        # TODO(synk): optional int8 weight-only quantization (per-column f32
        # scales) for w1/w2 on v5e/v6e (~2x MXU throughput on the 2*H^2 layers).
        # TODO(synk): on v7x, consider fp8(e4m3) storage for w1/w2 with bf16
        # activations and f32 accumulation (v7x MXU has no int path).

    def __call__(self, x):
        # x: (B, C, T, D_in); Linear is applied over the last axis.
        b, c, t, d_in = x.shape
        x2d = x.reshape(b * c * t, d_in)
        out2d = fused_mlp(x2d, self.w0, self.w1, self.w2, self.w3,
                          d_out=self.output_dim, tile_m=self.tile_m)
        outputs = out2d.reshape(b, c, t, self.output_dim)
        p = self.prediction_horizon
        outputs = outputs.reshape(b, c, t * p, self.output_dim // p)
        return {MODELS_TENSOR_PREDICITONS_KEY: outputs, OTHER_KEY: {}}


# ----------------------------------------------------------------------------
if __name__ == "__main__":
    key = jax.random.PRNGKey(0)
    k_x, k_w = jax.random.split(key)

    # Small shapes consistent with the module's 4-D input expectation.
    B, C, T = 2, 4, 16
    INPUT_DIM = 32
    OUTPUT_DIM = 64
    L0_UNITS = 128
    PRED_HORIZON = 2

    x = jax.random.normal(k_x, (B, C, T, INPUT_DIM), dtype=jnp.float32)

    model = EncoderDecoderPredictorPallas(
        input_dim=INPUT_DIM,
        output_dim=OUTPUT_DIM,
        prediction_horizon=PRED_HORIZON,
        l0_units=L0_UNITS,
        key=k_w,
        tile_m=None,  # auto tile selection (>=2 grid steps, 16-row floor)
    )

    out = model(x)
    preds = jax.block_until_ready(out[MODELS_TENSOR_PREDICITONS_KEY])

    # Pure-JAX reference mirroring the kernel's numerics (bf16 weights &
    # activations, f32 accumulation, bf16-rounded output).
    def ref_forward(xin):
        f32 = jnp.float32
        to_bf = lambda a: a.astype(jnp.bfloat16).astype(f32)
        mm = lambda a, b: jnp.dot(a, b, precision=jax.lax.Precision.HIGHEST)
        h = to_bf(xin.reshape(-1, INPUT_DIM))
        h = jnp.maximum(mm(h, to_bf(model.w0_f32)), 0.0)
        h = jnp.maximum(mm(to_bf(h), to_bf(model.w1_f32)), 0.0)
        h = jnp.maximum(mm(to_bf(h), to_bf(model.w2_f32)), 0.0)
        o = mm(to_bf(h), to_bf(model.w3_f32))
        o = o.astype(jnp.bfloat16).astype(f32)  # kernel writes bf16 output
        return o.reshape(B, C, T * PRED_HORIZON, OUTPUT_DIM // PRED_HORIZON)

    ref_out = jax.block_until_ready(ref_forward(x))

    assert preds.shape == (B, C, T * PRED_HORIZON, OUTPUT_DIM // PRED_HORIZON)
    assert preds.dtype == jnp.float32
    # Tolerance covers 1-ulp bf16 rounding differences on the final store.
    assert jnp.allclose(preds, ref_out, atol=1e-2, rtol=1e-2)

    print("KERNEL_OK")
</pallas_src>

<mosaic_0001>
module attributes {stable_mosaic.version = 11 : i64} {
  func.func @_mlp_kernel(%arg0: i32, %arg1: memref<64x32xf32, #tpu.memory_space<vmem>>, %arg2: memref<32x128xbf16, #tpu.memory_space<vmem>>, %arg3: memref<128x128xbf16, #tpu.memory_space<vmem>>, %arg4: memref<128x128xbf16, #tpu.memory_space<vmem>>, %arg5: memref<128x128xbf16, #tpu.memory_space<vmem>>, %arg6: memref<64x128xbf16, #tpu.memory_space<vmem>>) attributes {dimension_semantics = [#tpu.dimension_semantics<parallel>], iteration_bounds = array<i64: 2>, scalar_prefetch = 0 : i64, scratch_operands = 0 : i64, tpu.core_type = #tpu.core_type<tc>, window_params = [{transform_indices = @transform_0, window_bounds = array<i64: 64, 32>}, {pipeline_mode = #tpu.pipeline_mode<synchronous>, transform_indices = @transform_1, window_bounds = array<i64: 32, 128>}, {pipeline_mode = #tpu.pipeline_mode<synchronous>, transform_indices = @transform_2, window_bounds = array<i64: 128, 128>}, {pipeline_mode = #tpu.pipeline_mode<synchronous>, transform_indices = @transform_3, window_bounds = array<i64: 128, 128>}, {pipeline_mode = #tpu.pipeline_mode<synchronous>, transform_indices = @transform_4, window_bounds = array<i64: 128, 128>}, {transform_indices = @transform_5, window_bounds = array<i64: 64, 128>}]} {
    %c0 = arith.constant 0 : index
    %c0_0 = arith.constant 0 : index
    %0 = vector.load %arg1[%c0, %c0_0] : memref<64x32xf32, #tpu.memory_space<vmem>>, vector<64x32xf32>
    %1 = arith.truncf %0 : vector<64x32xf32> to vector<64x32xbf16>
    %c0_1 = arith.constant 0 : index
    %c0_2 = arith.constant 0 : index
    %2 = vector.load %arg2[%c0_1, %c0_2] : memref<32x128xbf16, #tpu.memory_space<vmem>>, vector<32x128xbf16>
    %cst = arith.constant dense<0.000000e+00> : vector<64x128xf32>
    %3 = tpu.matmul %1, %2, %cst {dimension_numbers = #tpu.dot_dimension_numbers<[1], [0], [0], [1], [0, 0, 1, 1], [], []>} : vector<64x32xbf16>, vector<32x128xbf16>, vector<64x128xf32> -> vector<64x128xf32>
    %cst_3 = arith.constant 0.000000e+00 : f32
    %4 = vector.broadcast %cst_3 : f32 to vector<64x128xf32>
    %5 = arith.maximumf %3, %4 : vector<64x128xf32>
    %6 = arith.truncf %5 : vector<64x128xf32> to vector<64x128xbf16>
    %c0_4 = arith.constant 0 : index
    %c0_5 = arith.constant 0 : index
    %7 = vector.load %arg3[%c0_4, %c0_5] : memref<128x128xbf16, #tpu.memory_space<vmem>>, vector<128x128xbf16>
    %cst_6 = arith.constant dense<0.000000e+00> : vector<64x128xf32>
    %8 = tpu.matmul %6, %7, %cst_6 {dimension_numbers = #tpu.dot_dimension_numbers<[1], [0], [0], [1], [0, 0, 1, 1], [], []>} : vector<64x128xbf16>, vector<128x128xbf16>, vector<64x128xf32> -> vector<64x128xf32>
    %cst_7 = arith.constant 0.000000e+00 : f32
    %9 = vector.broadcast %cst_7 : f32 to vector<64x128xf32>
    %10 = arith.maximumf %8, %9 : vector<64x128xf32>
    %11 = arith.truncf %10 : vector<64x128xf32> to vector<64x128xbf16>
    %c0_8 = arith.constant 0 : index
    %c0_9 = arith.constant 0 : index
    %12 = vector.load %arg4[%c0_8, %c0_9] : memref<128x128xbf16, #tpu.memory_space<vmem>>, vector<128x128xbf16>
    %cst_10 = arith.constant dense<0.000000e+00> : vector<64x128xf32>
    %13 = tpu.matmul %11, %12, %cst_10 {dimension_numbers = #tpu.dot_dimension_numbers<[1], [0], [0], [1], [0, 0, 1, 1], [], []>} : vector<64x128xbf16>, vector<128x128xbf16>, vector<64x128xf32> -> vector<64x128xf32>
    %cst_11 = arith.constant 0.000000e+00 : f32
    %14 = vector.broadcast %cst_11 : f32 to vector<64x128xf32>
    %15 = arith.maximumf %13, %14 : vector<64x128xf32>
    %16 = arith.truncf %15 : vector<64x128xf32> to vector<64x128xbf16>
    %c0_12 = arith.constant 0 : index
    %c0_13 = arith.constant 0 : index
    %17 = vector.load %arg5[%c0_12, %c0_13] : memref<128x128xbf16, #tpu.memory_space<vmem>>, vector<128x128xbf16>
    %cst_14 = arith.constant dense<0.000000e+00> : vector<64x128xf32>
    %18 = tpu.matmul %16, %17, %cst_14 {dimension_numbers = #tpu.dot_dimension_numbers<[1], [0], [0], [1], [0, 0, 1, 1], [], []>} : vector<64x128xbf16>, vector<128x128xbf16>, vector<64x128xf32> -> vector<64x128xf32>
    %19 = arith.truncf %18 : vector<64x128xf32> to vector<64x128xbf16>
    %c0_15 = arith.constant 0 : index
    %c0_16 = arith.constant 0 : index
    %20 = vector.load %arg6[%c0_15, %c0_16] : memref<64x128xbf16, #tpu.memory_space<vmem>>, vector<64x128xbf16>
    tpu.vector_store %arg6[%c0_15, %c0_16], %19 {strides = array<i32>} : memref<64x128xbf16, #tpu.memory_space<vmem>>, vector<64x128xbf16>,
    return
  }
  func.func @transform_0(%arg0: i32) -> (i32, i32) {
    %c0_i32 = arith.constant 0 : i32
    %c0_i32_0 = arith.constant 0 : i32
    return %arg0, %c0_i32 : i32, i32
  }
  func.func @transform_1(%arg0: i32) -> (i32, i32) {
    %c0_i32 = arith.constant 0 : i32
    %c0_i32_0 = arith.constant 0 : i32
    %c0_i32_1 = arith.constant 0 : i32
    return %c0_i32, %c0_i32_0 : i32, i32
  }
  func.func @transform_2(%arg0: i32) -> (i32, i32) {
    %c0_i32 = arith.constant 0 : i32
    %c0_i32_0 = arith.constant 0 : i32
    %c0_i32_1 = arith.constant 0 : i32
    return %c0_i32, %c0_i32_0 : i32, i32
  }
  func.func @transform_3(%arg0: i32) -> (i32, i32) {
    %c0_i32 = arith.constant 0 : i32
    %c0_i32_0 = arith.constant 0 : i32
    %c0_i32_1 = arith.constant 0 : i32
    return %c0_i32, %c0_i32_0 : i32, i32
  }
  func.func @transform_4(%arg0: i32) -> (i32, i32) {
    %c0_i32 = arith.constant 0 : i32
    %c0_i32_0 = arith.constant 0 : i32
    %c0_i32_1 = arith.constant 0 : i32
    return %c0_i32, %c0_i32_0 : i32, i32
  }
  func.func @transform_5(%arg0: i32) -> (i32, i32) {
    %c0_i32 = arith.constant 0 : i32
    %c0_i32_0 = arith.constant 0 : i32
    return %arg0, %c0_i32 : i32, i32
  }
}

</mosaic_0001>

<bundles_post_ra>
// kernel: fused_mlp.1
= control target key start
LH: loop header
LB: loop body
LE: loop exit
PB: predicated region body
PF: predicated region fallthrough
CT: control target
= control target key end

     0   :  { %10 = vsyncpa [#allocation3], 0  ;;  %s1207_s18 = smov 0   ;;  %s1307_s0 = inlined_call_operand.vmem [shape: f32[128,32], index: 0, kind: input, shape index: {}]   ;;  %s1308_s1 = inlined_call_operand.vmem [shape: bf16[32,128], index: 1, kind: input, shape index: {}]   ;;  %s1309_s2 = inlined_call_operand.vmem [shape: bf16[128,128], index: 2, kind: input, shape index: {}]   ;;  %s1310_s3 = inlined_call_operand.vmem [shape: bf16[128,128], index: 3, kind: input, shape index: {}]   ;;  %s1311_s4 = inlined_call_operand.hbm [shape: bf16[128,128], index: 4, kind: input, shape index: {}]   ;;  %s1312_s5 = inlined_call_operand.vmem [shape: bf16[128,128], index: 5, kind: output, shape index: {}]  }
   0x1 LB: > { %s881_s19 = sadd.s32 4294967295, %s1172_s18   ;;  %p883_p0 = scmp.ge.s32.totalorder %s1172_s18, 1  ;;  %s1172_s18 = sphi %s1207_s18, %s16_s18  }
   0x2   : > { %p157_p1 = scmp.lt.s32.totalorder %s1172_s18, 3  ;;  %s1174_s20 = smov [#allocation2]  }
   0x3   : > { %s178_s21 = sshll.u32 %s1174_s20, 4  ;;  %p1219_p3 = scmp.eq.s32.totalorder %s881_s19, 0  ;;  %s179_s21 = int_to_ptr.vmem [resolvable:$true] %s178_s21 }
   0x4   : > { %p1215_p2 = pnand %p883_p0, %p157_p1  ;;  %s1147_s24 = scalar_lea.vmem %s179_s21, 1024 }
   0x5   : > { %p1148_p7 = scmp.ne.s32.totalorder %s179_s21, %s1147_s24  ;;  %p1155_p10 = scmp.lt.s32.totalorder %s179_s21, %s179_s21 }
   0x6   : > { %p1093_p4 = pneg %p1215_p2  ;;  %p1156_p11 = scmp.lt.s32.totalorder %s1147_s24, %s1147_s24 }
   0x8   : > { %p1094_p5 = pnand %p1219_p3, %p1093_p4  ;;  %p1157_p12 = por %p1156_p11, %p1155_p10 }
   0xa   : > { %p1138_p6 = pneg %p1094_p5 }
   0xc   : > { %p1150_p8 = pnand %p1148_p7, %p1138_p6 }
   0xe   : > { %p1151_p9 = pneg %p1150_p8 }
  0x10   : > { %p1158_p13 = pnand %p1157_p12, %p1151_p9 }
  0x12   : > { %1161 = shalt.err (!%p1158_p13)
}
  0x13   : > { %s1175_s25 = smov 64   ;;  %s1176_s26 = smov 4  }
  0x14   : > { %1096 = dma.hbm_to_vmem [thread:$0]  (!%p1094_p5), %s1311_s4, 1024, %s179_s21, [#allocation3], %s1175_s25, %s1175_s25, %s1176_s26  }
  0x15   : > { %203 = sbr.rel (%p1215_p2) target bundleno = 859 (0x35b), region = 40 }
  0x1a   : > { %1167 = dma.done.wait (%p1219_p3), [#allocation3], 1024  }
  0x1b   : > { %1169 = vsyncadd (%p1219_p3), [#allocation3], 4294966272  ;;  %s888_s29 = sshll.u32 %s881_s19, 3  ;;  %v1110_v0 = vld [vmem:[%s1308_s1 + $0x8] sm:$0xff]   ;;  %v1111_v1 = vld [vmem:[%s1308_s1] sm:$0xff]   ;;  %vm272_vm0 = vcmask 261120  }
  0x1c   : > { %p232_p0 = scmp.lt.s32.totalorder %s888_s29, 15  ;;  %1005 = vmatprep.subr.bf16.mxu0 %v1110_v0  ;;  %v1112_v9 = vld [vmem:[%s1309_s2 + $0x38] sm:$0xff]   ;;  %v1113_v11 = vld [vmem:[%s1309_s2 + $0x30] sm:$0xff]   ;;  %v1114_v15 = vld [vmem:[%s1309_s2 + $0x28] sm:$0xff]  }
  0x1d   : > { %1006 = vmatpush3.bf16.msra.mxu0 %v1110_v0  ;;  %1017 = vmatprep.subr.bf16.mxu1 %v1112_v9  ;;  %v1115_v16 = vld [vmem:[%s1309_s2 + $0x20] sm:$0xff]   ;;  %v1116_v18 = vld [vmem:[%s1309_s2 + $0x18] sm:$0xff]   ;;  %v1117_v19 = vld [vmem:[%s1309_s2 + $0x10] sm:$0xff]  }
  0x1e   : > { %s1316_s29 = smov (!%p232_p0, %s888_s29), 15  ;;  %1007 = vmatprep.subr.bf16.mxu0 %v1111_v1  ;;  %1018 = vmatpush3.bf16.msra.mxu1 %v1112_v9  ;;  %v1118_v20 = vld [vmem:[%s1309_s2 + $0x8] sm:$0xff]   ;;  %v1119_v21 = vld [vmem:[%s1309_s2] sm:$0xff]   ;;  %v1120_v22 = vld [vmem:[%s1310_s3 + $0x38] sm:$0xff]  }
  0x1f   : > { %s889_s30 = sshll.u32 %s1316_s29, 3  ;;  %1019 = vmatprep.subr.bf16.mxu1 %v1113_v11  ;;  %v1121_v23 = vld [vmem:[%s1310_s3 + $0x30] sm:$0xff]   ;;  %v1122_v24 = vld [vmem:[%s1310_s3 + $0x28] sm:$0xff]   ;;  %v1123_v25 = vld [vmem:[%s1310_s3 + $0x20] sm:$0xff]   ;;  %s891_s23 = sshll.u32 %s1316_s29, 2 }
  0x20   : > { %s235_s8 = scalar_lea.vmem %s1307_s0, %s889_s30  ;;  %v1124_v26 = vld [vmem:[%s1310_s3 + $0x18] sm:$0xff]   ;;  %v1125_v47 = vld [vmem:[%s1310_s3 + $0x10] sm:$0xff]   ;;  %v1126_v48 = vld [vmem:[%s1310_s3 + $0x8] sm:$0xff]   ;;  %s241_s26 = scalar_lea.vmem %s1312_s5, %s891_s23 }
  0x21   : > { %v244_v2 = vld [vmem:[%s235_s8] sm:$0xff]  ;;  %v245_v3 = vld [vmem:[%s235_s8 + $0x8] sm:$0xff]  ;;  %v246_v5 = vld [vmem:[%s235_s8 + $0x10] sm:$0xff]  ;;  %1008 = vmatpush3.bf16.msra.mxu0 %v1111_v1 }
  0x22   : > { %v252_v4 = vpack.c.bf16 %v245_v3, %v244_v2  ;;  %v247_v6 = vld [vmem:[%s235_s8 + $0x18] sm:$0xff]  ;;  %v248_v7 = vld [vmem:[%s235_s8 + $0x20] sm:$0xff]  ;;  %v249_v8 = vld [vmem:[%s235_s8 + $0x28] sm:$0xff]  ;;  %1020 = vmatpush3.bf16.msra.mxu1 %v1113_v11  ;;  %1041 = vmatprep.subr.bf16.mxu0 %v1120_v22 }
  0x23   : > { %v253_v10 = vpack.c.bf16 %v247_v6, %v246_v5  ;;  %v254_v12 = vpack.c.bf16 %v249_v8, %v248_v7  ;;  %v250_v13 = vld [vmem:[%s235_s8 + $0x30] sm:$0xff]  ;;  %v251_v14 = vld [vmem:[%s235_s8 + $0x38] sm:$0xff]  ;;  %1021 = vmatprep.subr.bf16.mxu1 %v1114_v15  ;;  %v1127_v49 = vld [vmem:[%s1310_s3] sm:$0xff]  }
  0x24   : > { %1009 = vmatprep.mubr.msk.bf16.mxu0 %vm272_vm0, %v252_v4  ;;  %v255_v17 = vpack.c.bf16 %v251_v14, %v250_v13  ;;  %v1128_v50 = vld [vmem:[#allocation2 + $0x38] sm:$0xff]   ;;  %v1129_v51 = vld [vmem:[#allocation2 + $0x30] sm:$0xff]   ;;  %v1130_v52 = vld [vmem:[#allocation2 + $0x28] sm:$0xff]  }
  0x25   : > { %1010 = vmatmul.mubr.msk.bf16.vlgmr.msra.gmra.mxu0 %vm272_vm0, %v253_v10  ;;  %v1131_v53 = vld [vmem:[#allocation2 + $0x20] sm:$0xff]   ;;  %v1132_v54 = vld [vmem:[#allocation2 + $0x18] sm:$0xff]   ;;  %v1133_v11 = vld [vmem:[#allocation2 + $0x10] sm:$0xff]  }
  0x26   : > { %1013 = vmatprep.mubr.msk.bf16.mxu0 %vm272_vm0, %v254_v12  ;;  %1022 = vmatpush3.bf16.msra.mxu1 %v1114_v15  ;;  %v1134_v12 = vld [vmem:[#allocation2 + $0x8] sm:$0xff]   ;;  %v1135_v13 = vld [vmem:[#allocation2] sm:$0xff]  }
  0x27   : > { %1023 = vmatprep.subr.bf16.mxu1 %v1115_v16  ;;  %1042 = vmatpush3.bf16.msra.mxu0 %v1120_v22 }
  0x28   : > { %1043 = vmatprep.subr.bf16.mxu0 %v1121_v23 }
  0x2a   : > { %1024 = vmatpush3.bf16.msra.mxu1 %v1115_v16 }
  0x2b   : > { %1025 = vmatprep.subr.bf16.mxu1 %v1116_v18  ;;  %1044 = vmatpush3.bf16.msra.mxu0 %v1121_v23 }
  0x2c   : > { %1045 = vmatprep.subr.bf16.mxu0 %v1122_v24 }
  0x2d   : > { %1014 = vmatmul.mubr.msk.bf16.gmra.mxu0 %vm272_vm0, %v255_v17 }
  0x2e   : > { %1026 = vmatpush3.bf16.msra.mxu1 %v1116_v18 }
  0x2f   : > { %1027 = vmatprep.subr.bf16.mxu1 %v1117_v19  ;;  %1046 = vmatpush3.bf16.msra.mxu0 %v1122_v24 }
  0x30   : > { %1047 = vmatprep.subr.bf16.mxu0 %v1123_v25 }
  0x32   : > { %1028 = vmatpush3.bf16.msra.mxu1 %v1117_v19 }
  0x33   : > { %1029 = vmatprep.subr.bf16.mxu1 %v1118_v20  ;;  %1048 = vmatpush3.bf16.msra.mxu0 %v1123_v25 }
  0x34   : > { %1049 = vmatprep.subr.bf16.mxu0 %v1124_v26 }
  0x36   : > { %1030 = vmatpush3.bf16.msra.mxu1 %v1118_v20 }
  0x37   : > { %1031 = vmatprep.subr.bf16.mxu1 %v1119_v21  ;;  %1050 = vmatpush3.bf16.msra.mxu0 %v1124_v26 }
  0x38   : > { %1051 = vmatprep.subr.bf16.mxu0 %v1125_v47 }
  0x3a   : > { %1032 = vmatpush3.bf16.msra.mxu1 %v1119_v21 }
  0x3b   : > { %1052 = vmatpush3.bf16.msra.mxu0 %v1125_v47  ;;  %1065 = vmatprep.subr.bf16.mxu1 %v1128_v50 }
  0x3c   : > { %1053 = vmatprep.subr.bf16.mxu0 %v1126_v48 }
  0x3f   : > { %1054 = vmatpush3.bf16.msra.mxu0 %v1126_v48 }
  0x40   : > { %1055 = vmatprep.subr.bf16.mxu0 %v1127_v49 }
  0x43   : > { %1056 = vmatpush3.bf16.msra.mxu0 %v1127_v49 }
  0xe5   : > { %v1011_v27 = vpop.f32.mrf.mxu0 }
  0xe6   : > { %v352_v34 = vmax.f32 %v1011_v27, 0.0 }
  0xe7   : > { %v319_v28 = vpop.f32.mrf.mxu0 }
  0xe8   : > { %v350_v32 = vmax.f32 %v319_v28, 0.0 }
  0xe9   : > { %v1012_v29 = vpop.f32.mrf.mxu0 }
  0xea   : > { %v353_v30 = vmax.f32 %v1012_v29, 0.0 }
  0xeb   : > { %v322_v31 = vpop.f32.mrf.mxu0 }
  0xec   : > { %v351_v33 = vmax.f32 %v322_v31, 0.0  ;;  %v359_v37 = vpack.c.bf16 %v353_v30, %v352_v34 }
  0xed   : > { %v1015_v35 = vpop.f32.mrf.mxu0 }
  0xee   : > { %v358_v36 = vpack.c.bf16 %v351_v33, %v350_v32  ;;  %v356_v44 = vmax.f32 %v1015_v35, 0.0 }
  0xef   : > { %v335_v38 = vpop.f32.mrf.mxu0 }
  0xf0   : > { %1033 = vmatprep.mubr.bf16.mxu1 %v358_v36  ;;  %v354_v42 = vmax.f32 %v335_v38, 0.0 }
  0xf1   : > { %v1016_v39 = vpop.f32.mrf.mxu0  ;;  %1034 = vmatmul.mubr.bf16.vlgmr.msra.gmra.mxu1 %v359_v37 }
  0xf2   : > { %v357_v40 = vmax.f32 %v1016_v39, 0.0  ;;  %1066 = vmatpush3.bf16.msra.mxu1 %v1128_v50 }
  0xf3   : > { %v338_v41 = vpop.f32.mrf.mxu0  ;;  %1067 = vmatprep.subr.bf16.mxu1 %v1129_v51 }
  0xf4   : > { %v355_v43 = vmax.f32 %v338_v41, 0.0  ;;  %v361_v46 = vpack.c.bf16 %v357_v40, %v356_v44 }
  0xf6   : > { %v360_v45 = vpack.c.bf16 %v355_v43, %v354_v42  ;;  %1068 = vmatpush3.bf16.msra.mxu1 %v1129_v51 }
  0xf7   : > { %1069 = vmatprep.subr.bf16.mxu1 %v1130_v52 }
  0xf8   : > { %1037 = vmatprep.mubr.bf16.mxu1 %v360_v45 }
  0xf9   : > { %1038 = vmatmul.mubr.bf16.gmra.mxu1 %v361_v46 }
  0xfa   : > { %1070 = vmatpush3.bf16.msra.mxu1 %v1130_v52 }
  0xfb   : > { %1071 = vmatprep.subr.bf16.mxu1 %v1131_v53 }
  0xfe   : > { %1072 = vmatpush3.bf16.msra.mxu1 %v1131_v53 }
  0xff   : > { %1073 = vmatprep.subr.bf16.mxu1 %v1132_v54 }
 0x102   : > { %1074 = vmatpush3.bf16.msra.mxu1 %v1132_v54 }
 0x103   : > { %1075 = vmatprep.subr.bf16.mxu1 %v1133_v11 }
 0x106   : > { %1076 = vmatpush3.bf16.msra.mxu1 %v1133_v11 }
 0x107   : > { %1077 = vmatprep.subr.bf16.mxu1 %v1134_v12 }
 0x10a   : > { %1078 = vmatpush3.bf16.msra.mxu1 %v1134_v12 }
 0x10b   : > { %1079 = vmatprep.subr.bf16.mxu1 %v1135_v13 }
 0x10e   : > { %1080 = vmatpush3.bf16.msra.mxu1 %v1135_v13 }
 0x1b1   : > { %v1035_v55 = vpop.f32.mrf.mxu1 }
 0x1b2   : > { %v493_v62 = vmax.f32 %v1035_v55, 0.0 }
 0x1b3   : > { %v460_v56 = vpop.f32.mrf.mxu1 }
 0x1b4   : > { %v491_v60 = vmax.f32 %v460_v56, 0.0 }
 0x1b5   : > { %v1036_v57 = vpop.f32.mrf.mxu1 }
 0x1b6   : > { %v494_v58 = vmax.f32 %v1036_v57, 0.0 }
 0x1b7   : > { %v463_v59 = vpop.f32.mrf.mxu1 }
 0x1b8   : > { %v492_v61 = vmax.f32 %v463_v59, 0.0  ;;  %v500_v1 = vpack.c.bf16 %v494_v58, %v493_v62 }
 0x1b9   : > { %v1039_v63 = vpop.f32.mrf.mxu1 }
 0x1ba   : > { %v499_v0 = vpack.c.bf16 %v492_v61, %v491_v60  ;;  %v497_v8 = vmax.f32 %v1039_v63, 0.0 }
 0x1bb   : > { %v476_v2 = vpop.f32.mrf.mxu1 }
 0x1bc   : > { %1057 = vmatprep.mubr.bf16.mxu0 %v499_v0  ;;  %v495_v6 = vmax.f32 %v476_v2, 0.0 }
 0x1bd   : > { %v1040_v3 = vpop.f32.mrf.mxu1  ;;  %1058 = vmatmul.mubr.bf16.vlgmr.msra.gmra.mxu0 %v500_v1 }
 0x1be   : > { %v498_v4 = vmax.f32 %v1040_v3, 0.0 }
 0x1bf   : > { %v479_v5 = vpop.f32.mrf.mxu1 }
 0x1c0   : > { %v496_v7 = vmax.f32 %v479_v5, 0.0  ;;  %v502_v10 = vpack.c.bf16 %v498_v4, %v497_v8 }
 0x1c2   : > { %v501_v9 = vpack.c.bf16 %v496_v7, %v495_v6 }
 0x1c4   : > { %1061 = vmatprep.mubr.bf16.mxu0 %v501_v9 }
 0x1c5   : > { %1062 = vmatmul.mubr.bf16.gmra.mxu0 %v502_v10 }
 0x27d   : > { %v1059_v14 = vpop.f32.mrf.mxu0 }
 0x27e   : > { %v634_v21 = vmax.f32 %v1059_v14, 0.0 }
 0x27f   : > { %v601_v15 = vpop.f32.mrf.mxu0 }
 0x280   : > { %v632_v19 = vmax.f32 %v601_v15, 0.0 }
 0x281   : > { %v1060_v16 = vpop.f32.mrf.mxu0 }
 0x282   : > { %v635_v17 = vmax.f32 %v1060_v16, 0.0 }
 0x283   : > { %v604_v18 = vpop.f32.mrf.mxu0 }
 0x284   : > { %v633_v20 = vmax.f32 %v604_v18, 0.0  ;;  %v641_v24 = vpack.c.bf16 %v635_v17, %v634_v21 }
 0x285   : > { %v1063_v22 = vpop.f32.mrf.mxu0 }
 0x286   : > { %v640_v23 = vpack.c.bf16 %v633_v20, %v632_v19  ;;  %v638_v31 = vmax.f32 %v1063_v22, 0.0 }
 0x287   : > { %v617_v25 = vpop.f32.mrf.mxu0 }
 0x288   : > { %1081 = vmatprep.mubr.bf16.mxu1 %v640_v23  ;;  %v636_v29 = vmax.f32 %v617_v25, 0.0 }
 0x289   : > { %v1064_v26 = vpop.f32.mrf.mxu0  ;;  %1082 = vmatmul.mubr.bf16.vlgmr.msra.gmra.mxu1 %v641_v24 }
 0x28a   : > { %v639_v27 = vmax.f32 %v1064_v26, 0.0 }
 0x28b   : > { %v620_v28 = vpop.f32.mrf.mxu0 }
 0x28c   : > { %v637_v30 = vmax.f32 %v620_v28, 0.0  ;;  %v643_v33 = vpack.c.bf16 %v639_v27, %v638_v31 }
 0x28e   : > { %v642_v32 = vpack.c.bf16 %v637_v30, %v636_v29 }
 0x290   : > { %1085 = vmatprep.mubr.bf16.mxu1 %v642_v32 }
 0x291   : > { %1086 = vmatmul.mubr.bf16.gmra.mxu1 %v643_v33 }
 0x349   : > { %v1083_v34 = vpop.f32.mrf.mxu1 }
 0x34b   : > { %v742_v35 = vpop.f32.mrf.mxu1 }
 0x34d   : > { %v1084_v36 = vpop.f32.mrf.mxu1 }
 0x34e   : > { %v948_v37 = vpack.c.bf16 %v1084_v36, %v1083_v34 }
 0x34f   : > { %v745_v38 = vpop.f32.mrf.mxu1 }
 0x350   : > { %960 = vst [vmem:[%s241_s26 + $0x8] sm:$0xff] %v948_v37   ;;  %v943_v39 = vpack.c.bf16 %v745_v38, %v742_v35 }
 0x351   : > { %v1087_v40 = vpop.f32.mrf.mxu1 }
 0x352   : > { %944 = vst [vmem:[%s241_s26] sm:$0xff] %v943_v39  }
 0x353   : > { %v758_v41 = vpop.f32.mrf.mxu1 }
 0x355   : > { %v1088_v42 = vpop.f32.mrf.mxu1 }
 0x356   : > { %v958_v43 = vpack.c.bf16 %v1088_v42, %v1087_v40 }
 0x357   : > { %v761_v44 = vpop.f32.mrf.mxu1 }
 0x358   : > { %962 = vst [vmem:[%s241_s26 + $0x18] sm:$0xff] %v958_v43   ;;  %v953_v45 = vpack.c.bf16 %v761_v44, %v758_v41 }
 0x35a   : > { %961 = vst [vmem:[%s241_s26 + $0x10] sm:$0xff] %v953_v45  }
 0x35b PF: > { %s16_s18 = sadd.s32 1, %s1172_s18  }
 0x35c   : > { %p13_p1 = scmp.ge.s32.totalorder %s16_s18, 4  }
 0x35e   :  { %15 = sbr.rel (!%p13_p1) target bundleno = 1 (0x1), region = 75 }
 0x363   :  { %835 = vsyncpa [#allocation3], 1 }
 0x364   :  { %837 = vsyncpa [#allocation3 + $0x1], 1 }

</bundles_post_ra>
